<compile_context>
chip_gen: v6e
topology: v6e:2x2x1
jax: 0.10.0
libtpu: 0.0.40
codegen_flags: <defaults>
</compile_context>

<pallas_src>
import functools

import jax
import jax.numpy as jnp
from jax import lax
from jax.experimental import pallas as pl
from jax.experimental.pallas import tpu as pltpu


def _conv_stats_kernel(x_ref, w_ref, o_ref, psum_ref, psq_ref):
    """One (image, Wo-block, row-tile) step: banded matmul + streaming BN stats.

    x_ref:    (1, 1, TH, K*WB*C_in)   bf16  pre-gathered input band rows
    w_ref:    (K*WB*C_in, BW*C_out)   bf16  banded lowered conv weight
    o_ref:    (1, 1, TH, BW*C_out)    bf16  conv output row tile (lane-dense)
    psum_ref: (1, 1, 1,  BW*C_out)    f32   streaming per-(image, Wo-block) sum
    psq_ref:  (1, 1, 1,  BW*C_out)    f32   streaming sum of squares
    """
    t = pl.program_id(2)

    # Single wide matmul: contraction = K*WB*C_in (all K row taps folded in).
    acc = jnp.dot(x_ref[0, 0], w_ref[...], preferred_element_type=jnp.float32)

    # Lane-dense bf16 store of the conv output.
    o_ref[0, 0] = acc.astype(o_ref.dtype)

    # BN statistics from the f32 accumulator (not from the bf16 store).
    s = jnp.sum(acc, axis=0, keepdims=True)         # (1, BW*C_out)
    s2 = jnp.sum(acc * acc, axis=0, keepdims=True)  # (1, BW*C_out)

    @pl.when(t == 0)
    def _():
        psum_ref[0, 0] = s
        psq_ref[0, 0] = s2

    @pl.when(t != 0)
    def _():
        psum_ref[0, 0] = psum_ref[0, 0] + s
        psq_ref[0, 0] = psq_ref[0, 0] + s2


@functools.partial(jax.jit, static_argnames=("stride", "padding", "eps"))
def relu_conv_bn(x_nchw, w_oihw, gamma, beta, *, stride=1, padding=0, eps=1e-5):
    """Forward pass of ReLUConvBN (training-mode batch stats).

    x_nchw : (N, C_in, H, W)       -- PyTorch NCHW input
    w_oihw : (C_out, C_in, K, K)   -- PyTorch Conv2d weight (no bias)
    gamma  : (C_out,)              -- BN affine weight
    beta   : (C_out,)              -- BN affine bias
    returns: (N, C_out, Ho, Wo)    -- NCHW output
    """
    N, C_in, H, W = x_nchw.shape
    C_out, _, K, _ = w_oihw.shape
    s, p = stride, padding
    Ho = (H + 2 * p - K) // s + 1
    Wo = (W + 2 * p - K) // s + 1

    # ---- Wo block width: lane-dense output with minimal banded waste -------
    BW = Wo
    for cand in range(1, Wo + 1):
        if Wo % cand == 0 and cand * C_out >= 128:
            BW = cand
            break
    NWb = Wo // BW
    WB = (BW - 1) * s + K              # padded-input columns feeding one block
    KWBC = K * WB * C_in               # contraction width (>=128 for real sizes)
    BWC = BW * C_out                   # output lane width (>=128 when possible)

    # ---- glue: NHWC + ReLU + spatial zero-pad + bf16 (one fused XLA pass) --
    x_nhwc = jnp.maximum(jnp.transpose(x_nchw, (0, 2, 3, 1)), 0.0)   # ReLU here
    x_pad = jnp.pad(x_nhwc, ((0, 0), (p, p), (p, p), (0, 0))).astype(jnp.bfloat16)

    # ---- pre-gathered input bands: (N, NWb, Ho, K*WB*C_in), stride folded --
    rows = (jnp.arange(Ho) * s)[:, None] + jnp.arange(K)[None, :]        # (Ho, K)
    cols = (jnp.arange(NWb) * BW * s)[:, None] + jnp.arange(WB)[None, :]  # (NWb, WB)
    xb = x_pad[:, rows]                       # (N, Ho, K, Wp, C_in)
    xb = xb[:, :, :, cols]                    # (N, Ho, K, NWb, WB, C_in)
    xb = jnp.transpose(xb, (0, 3, 1, 2, 4, 5)).reshape(N, NWb, Ho, KWBC)

    # ---- banded lowered weight: (K*WB*C_in, BW*C_out), shared by all blocks
    # w_band[(kh*WB+wb)*C_in+ci, bw*C_out+co] = w[co, ci, kh, wb - bw*s] (0 if OOB)
    w_k = jnp.transpose(w_oihw, (2, 3, 1, 0)).astype(jnp.float32)  # (K,K,Ci,Co)
    kw_idx = jnp.arange(WB)[:, None] - jnp.arange(BW)[None, :] * s  # (WB, BW)
    valid = (kw_idx >= 0) & (kw_idx < K)
    wg = w_k[:, jnp.clip(kw_idx, 0, K - 1)]                         # (K,WB,BW,Ci,Co)
    wg = jnp.where(valid[None, :, :, None, None], wg, 0.0)
    w_band = jnp.transpose(wg, (0, 1, 3, 2, 4)).reshape(KWBC, BWC)
    w_band = w_band.astype(jnp.bfloat16)

    # ---- row tile TH: largest multiple-of-8 divisor of Ho within VMEM budget
    def _pick_th():
        budget = 12 * 1024 * 1024                      # per-kernel block budget
        fixed = 2 * KWBC * BWC * 2                     # weight, double-buffered
        cands = [d for d in range(8, min(Ho, 256) + 1, 8) if Ho % d == 0]
        cands = sorted(cands, reverse=True) or [Ho]
        for th in cands:
            blk = 2 * th * (KWBC + BWC) * 2            # x + o blocks, bf16, x2
            if fixed + blk <= budget:
                return th
        return cands[-1]

    TH = _pick_th()
    T = Ho // TH if Ho % TH == 0 else 1
    if Ho % TH != 0:
        TH = Ho

    blk_bytes = (2 * TH * (KWBC + BWC) * 2 + 2 * KWBC * BWC * 2 + 4 * 2 * BWC * 4)
    vmem_limit = int(min(64 << 20, max(32 << 20, 2 * blk_bytes)))  # v7x-safe cap

    # ---- fused ReLU'd-conv + streaming BN statistics ------------------------
    # TODO(synk): when N==1 on v7x, also split the row-tile axis across the two
    # TensorCores (per-core partial psum/psq) to avoid an idle core.
    conv, psum, psq = pl.pallas_call(
        _conv_stats_kernel,
        grid=(N, NWb, T),
        in_specs=[
            pl.BlockSpec((1, 1, TH, KWBC), lambda n, j, t: (n, j, t, 0)),
            pl.BlockSpec((KWBC, BWC), lambda n, j, t: (0, 0)),
        ],
        out_specs=[
            pl.BlockSpec((1, 1, TH, BWC), lambda n, j, t: (n, j, t, 0)),
            pl.BlockSpec((1, 1, 1, BWC), lambda n, j, t: (n, j, 0, 0)),  # accum
            pl.BlockSpec((1, 1, 1, BWC), lambda n, j, t: (n, j, 0, 0)),  # accum
        ],
        out_shape=[
            jax.ShapeDtypeStruct((N, NWb, Ho, BWC), jnp.bfloat16),
            jax.ShapeDtypeStruct((N, NWb, 1, BWC), jnp.float32),
            jax.ShapeDtypeStruct((N, NWb, 1, BWC), jnp.float32),
        ],
        compiler_params=pltpu.CompilerParams(
            dimension_semantics=("parallel", "parallel", "arbitrary"),
            vmem_limit_bytes=vmem_limit,
        ),
    )(xb, w_band)

    # ---- fold streamed stats into per-channel scale/shift -------------------
    # TODO(synk): running_mean/running_var buffer updates of BatchNorm2d are a
    # training-time side effect and are not emitted here.
    cnt = jnp.float32(N * Ho * Wo)
    sum_c = psum.reshape(N * NWb, BW, C_out).sum(axis=(0, 1))    # (C_out,)
    sumsq_c = psq.reshape(N * NWb, BW, C_out).sum(axis=(0, 1))   # (C_out,)
    mean = sum_c / cnt
    var = jnp.maximum(sumsq_c / cnt - mean * mean, 0.0)          # biased var
    inv = lax.rsqrt(var + jnp.float32(eps))
    scale_c = gamma.astype(jnp.float32) * inv
    shift_c = beta.astype(jnp.float32) - mean * scale_c

    # ---- BN apply fused into the final layout transpose (no extra kernel) ---
    y = conv.reshape(N, NWb, Ho, BW, C_out).astype(jnp.float32)
    y = y * scale_c + shift_c
    y = jnp.transpose(y, (0, 4, 2, 1, 3)).reshape(N, C_out, Ho, Wo)
    return y


def _reference(x_nchw, w_oihw, gamma, beta, stride, padding, eps):
    """Pure-JAX f32 reference matching PyTorch ReLU->Conv2d->BatchNorm2d (train)."""
    y = lax.conv_general_dilated(
        jnp.maximum(x_nchw, 0.0), w_oihw,
        window_strides=(stride, stride),
        padding=[(padding, padding), (padding, padding)],
        dimension_numbers=("NCHW", "OIHW", "NCHW"),
    )
    mean = jnp.mean(y, axis=(0, 2, 3), keepdims=True)
    var = jnp.mean((y - mean) ** 2, axis=(0, 2, 3), keepdims=True)
    yhat = (y - mean) * lax.rsqrt(var + eps)
    return yhat * gamma.reshape(1, -1, 1, 1) + beta.reshape(1, -1, 1, 1)


if __name__ == "__main__":
    # ReLUConvBN(C_in=4, C_out=8, kernel_size=3, stride=1, padding=1, affine=True)
    C_in, C_out, K, stride, padding = 4, 8, 3, 1, 1
    eps = 1e-5

    key = jax.random.PRNGKey(0)
    kx, kw = jax.random.split(key)
    x = jax.random.normal(kx, (2, C_in, 16, 16), dtype=jnp.float32)

    # Conv2d weight (O, I, K, K), no bias; BN affine defaults (weight=1, bias=0).
    w = jax.random.normal(kw, (C_out, C_in, K, K), dtype=jnp.float32) * 0.1
    gamma = jnp.ones((C_out,), dtype=jnp.float32)
    beta = jnp.zeros((C_out,), dtype=jnp.float32)

    out = relu_conv_bn(x, w, gamma, beta, stride=stride, padding=padding, eps=eps)
    out = jax.block_until_ready(out)

    ref = _reference(x, w, gamma, beta, stride, padding, eps)
    assert out.shape == ref.shape == (2, C_out, 16, 16), (out.shape, ref.shape)
    max_err = float(jnp.max(jnp.abs(out - ref)))
    # bf16 activations/weights/stored-conv on the MXU -> looser tolerance than f32.
    assert jnp.allclose(out, ref, atol=5e-2, rtol=5e-2), max_err

    print("KERNEL_OK")
</pallas_src>

<mosaic_0001>
module attributes {stable_mosaic.version = 11 : i64} {
  func.func @_conv_stats_kernel(%arg0: i32, %arg1: i32, %arg2: i32, %arg3: memref<1x1x16x216xbf16, #tpu.memory_space<vmem>>, %arg4: memref<216x128xbf16, #tpu.memory_space<vmem>>, %arg5: memref<1x1x16x128xbf16, #tpu.memory_space<vmem>>, %arg6: memref<1x1x1x128xf32, #tpu.memory_space<vmem>>, %arg7: memref<1x1x1x128xf32, #tpu.memory_space<vmem>>) attributes {dimension_semantics = [#tpu.dimension_semantics<parallel>, #tpu.dimension_semantics<parallel>, #tpu.dimension_semantics<arbitrary>], iteration_bounds = array<i64: 2, 1, 1>, scalar_prefetch = 0 : i64, scratch_operands = 0 : i64, tpu.core_type = #tpu.core_type<tc>, window_params = [{transform_indices = @transform_0, window_bounds = array<i64: 1, 1, 16, 216>}, {pipeline_mode = #tpu.pipeline_mode<synchronous>, transform_indices = @transform_1, window_bounds = array<i64: 216, 128>}, {transform_indices = @transform_2, window_bounds = array<i64: 1, 1, 16, 128>}, {transform_indices = @transform_3, window_bounds = array<i64: 1, 1, 1, 128>}, {transform_indices = @transform_4, window_bounds = array<i64: 1, 1, 1, 128>}]} {
    %c0 = arith.constant 0 : index
    %c0_0 = arith.constant 0 : index
    %c0_1 = arith.constant 0 : index
    %c0_2 = arith.constant 0 : index
    %0 = vector.load %arg3[%c0, %c0_0, %c0_1, %c0_2] : memref<1x1x16x216xbf16, #tpu.memory_space<vmem>>, vector<1x1x16x216xbf16>
    %1 = vector.shape_cast %0 : vector<1x1x16x216xbf16> to vector<16x216xbf16>
    %c0_3 = arith.constant 0 : index
    %c0_4 = arith.constant 0 : index
    %2 = vector.load %arg4[%c0_3, %c0_4] : memref<216x128xbf16, #tpu.memory_space<vmem>>, vector<216x128xbf16>
    %cst = arith.constant dense<0.000000e+00> : vector<16x128xf32>
    %3 = tpu.matmul %1, %2, %cst {dimension_numbers = #tpu.dot_dimension_numbers<[1], [0], [0], [1], [0, 0, 1, 1], [], []>} : vector<16x216xbf16>, vector<216x128xbf16>, vector<16x128xf32> -> vector<16x128xf32>
    %4 = arith.truncf %3 : vector<16x128xf32> to vector<16x128xbf16>
    %c0_5 = arith.constant 0 : index
    %c0_6 = arith.constant 0 : index
    %c0_7 = arith.constant 0 : index
    %c0_8 = arith.constant 0 : index
    %5 = vector.load %arg5[%c0_5, %c0_6, %c0_7, %c0_8] : memref<1x1x16x128xbf16, #tpu.memory_space<vmem>>, vector<1x1x16x128xbf16>
    %6 = vector.shape_cast %5 : vector<1x1x16x128xbf16> to vector<16x128xbf16>
    %7 = vector.shape_cast %4 : vector<16x128xbf16> to vector<1x1x16x128xbf16>
    tpu.vector_store %arg5[%c0_5, %c0_6, %c0_7, %c0_8], %7 {strides = array<i32>} : memref<1x1x16x128xbf16, #tpu.memory_space<vmem>>, vector<1x1x16x128xbf16>,
    %cst_9 = arith.constant dense<0.000000e+00> : vector<128xf32>
    %8 = vector.multi_reduction <add>, %3, %cst_9 [0] : vector<16x128xf32> to vector<128xf32>
    %9 = vector.shape_cast %8 : vector<128xf32> to vector<1x128xf32>
    %10 = arith.mulf %3, %3 : vector<16x128xf32>
    %cst_10 = arith.constant dense<0.000000e+00> : vector<128xf32>
    %11 = vector.multi_reduction <add>, %10, %cst_10 [0] : vector<16x128xf32> to vector<128xf32>
    %12 = vector.shape_cast %11 : vector<128xf32> to vector<1x128xf32>
    %c0_i32 = arith.constant 0 : i32
    %13 = arith.cmpi eq, %arg2, %c0_i32 : i32
    %14 = arith.extui %13 : i1 to i32
    %c0_i32_11 = arith.constant 0 : i32
    %15 = arith.cmpi ne, %14, %c0_i32_11 : i32
    scf.if %15 {
      %c0_14 = arith.constant 0 : index
      %c0_15 = arith.constant 0 : index
      %c0_16 = arith.constant 0 : index
      %c0_17 = arith.constant 0 : index
      %19 = vector.load %arg6[%c0_14, %c0_15, %c0_16, %c0_17] : memref<1x1x1x128xf32, #tpu.memory_space<vmem>>, vector<1x1x1x128xf32>
      %20 = vector.shape_cast %19 : vector<1x1x1x128xf32> to vector<1x128xf32>
      %21 = vector.shape_cast %9 : vector<1x128xf32> to vector<1x1x1x128xf32>
      tpu.vector_store %arg6[%c0_14, %c0_15, %c0_16, %c0_17], %21 {strides = array<i32>} : memref<1x1x1x128xf32, #tpu.memory_space<vmem>>, vector<1x1x1x128xf32>,
      %c0_18 = arith.constant 0 : index
      %c0_19 = arith.constant 0 : index
      %c0_20 = arith.constant 0 : index
      %c0_21 = arith.constant 0 : index
      %22 = vector.load %arg7[%c0_18, %c0_19, %c0_20, %c0_21] : memref<1x1x1x128xf32, #tpu.memory_space<vmem>>, vector<1x1x1x128xf32>
      %23 = vector.shape_cast %22 : vector<1x1x1x128xf32> to vector<1x128xf32>
      %24 = vector.shape_cast %12 : vector<1x128xf32> to vector<1x1x1x128xf32>
      tpu.vector_store %arg7[%c0_18, %c0_19, %c0_20, %c0_21], %24 {strides = array<i32>} : memref<1x1x1x128xf32, #tpu.memory_space<vmem>>, vector<1x1x1x128xf32>,
    } else {
    }
    %c0_i32_12 = arith.constant 0 : i32
    %16 = arith.cmpi ne, %arg2, %c0_i32_12 : i32
    %17 = arith.extui %16 : i1 to i32
    %c0_i32_13 = arith.constant 0 : i32
    %18 = arith.cmpi ne, %17, %c0_i32_13 : i32
    scf.if %18 {
      %c0_14 = arith.constant 0 : index
      %c0_15 = arith.constant 0 : index
      %c0_16 = arith.constant 0 : index
      %c0_17 = arith.constant 0 : index
      %19 = vector.load %arg6[%c0_14, %c0_15, %c0_16, %c0_17] : memref<1x1x1x128xf32, #tpu.memory_space<vmem>>, vector<1x1x1x128xf32>
      %20 = vector.shape_cast %19 : vector<1x1x1x128xf32> to vector<1x128xf32>
      %21 = arith.addf %20, %9 : vector<1x128xf32>
      %c0_18 = arith.constant 0 : index
      %c0_19 = arith.constant 0 : index
      %c0_20 = arith.constant 0 : index
      %c0_21 = arith.constant 0 : index
      %22 = vector.load %arg6[%c0_18, %c0_19, %c0_20, %c0_21] : memref<1x1x1x128xf32, #tpu.memory_space<vmem>>, vector<1x1x1x128xf32>
      %23 = vector.shape_cast %22 : vector<1x1x1x128xf32> to vector<1x128xf32>
      %24 = vector.shape_cast %21 : vector<1x128xf32> to vector<1x1x1x128xf32>
      tpu.vector_store %arg6[%c0_18, %c0_19, %c0_20, %c0_21], %24 {strides = array<i32>} : memref<1x1x1x128xf32, #tpu.memory_space<vmem>>, vector<1x1x1x128xf32>,
      %c0_22 = arith.constant 0 : index
      %c0_23 = arith.constant 0 : index
      %c0_24 = arith.constant 0 : index
      %c0_25 = arith.constant 0 : index
      %25 = vector.load %arg7[%c0_22, %c0_23, %c0_24, %c0_25] : memref<1x1x1x128xf32, #tpu.memory_space<vmem>>, vector<1x1x1x128xf32>
      %26 = vector.shape_cast %25 : vector<1x1x1x128xf32> to vector<1x128xf32>
      %27 = arith.addf %26, %12 : vector<1x128xf32>
      %c0_26 = arith.constant 0 : index
      %c0_27 = arith.constant 0 : index
      %c0_28 = arith.constant 0 : index
      %c0_29 = arith.constant 0 : index
      %28 = vector.load %arg7[%c0_26, %c0_27, %c0_28, %c0_29] : memref<1x1x1x128xf32, #tpu.memory_space<vmem>>, vector<1x1x1x128xf32>
      %29 = vector.shape_cast %28 : vector<1x1x1x128xf32> to vector<1x128xf32>
      %30 = vector.shape_cast %27 : vector<1x128xf32> to vector<1x1x1x128xf32>
      tpu.vector_store %arg7[%c0_26, %c0_27, %c0_28, %c0_29], %30 {strides = array<i32>} : memref<1x1x1x128xf32, #tpu.memory_space<vmem>>, vector<1x1x1x128xf32>,
    } else {
    }
    return
  }
  func.func @transform_0(%arg0: i32, %arg1: i32, %arg2: i32) -> (i32, i32, i32, i32) {
    %c0_i32 = arith.constant 0 : i32
    %c0_i32_0 = arith.constant 0 : i32
    return %arg0, %arg1, %arg2, %c0_i32 : i32, i32, i32, i32
  }
  func.func @transform_1(%arg0: i32, %arg1: i32, %arg2: i32) -> (i32, i32) {
    %c0_i32 = arith.constant 0 : i32
    %c0_i32_0 = arith.constant 0 : i32
    %c0_i32_1 = arith.constant 0 : i32
    return %c0_i32, %c0_i32_0 : i32, i32
  }
  func.func @transform_2(%arg0: i32, %arg1: i32, %arg2: i32) -> (i32, i32, i32, i32) {
    %c0_i32 = arith.constant 0 : i32
    %c0_i32_0 = arith.constant 0 : i32
    return %arg0, %arg1, %arg2, %c0_i32 : i32, i32, i32, i32
  }
  func.func @transform_3(%arg0: i32, %arg1: i32, %arg2: i32) -> (i32, i32, i32, i32) {
    %c0_i32 = arith.constant 0 : i32
    %c0_i32_0 = arith.constant 0 : i32
    %c0_i32_1 = arith.constant 0 : i32
    return %arg0, %arg1, %c0_i32, %c0_i32_0 : i32, i32, i32, i32
  }
  func.func @transform_4(%arg0: i32, %arg1: i32, %arg2: i32) -> (i32, i32, i32, i32) {
    %c0_i32 = arith.constant 0 : i32
    %c0_i32_0 = arith.constant 0 : i32
    %c0_i32_1 = arith.constant 0 : i32
    return %arg0, %arg1, %c0_i32, %c0_i32_0 : i32, i32, i32, i32
  }
}

</mosaic_0001>

<bundles_post_ra>
// kernel: relu_conv_bn.1
= control target key start
LH: loop header
LB: loop body
LE: loop exit
PB: predicated region body
PF: predicated region fallthrough
CT: control target
= control target key end

     0   :  { %s831_s15 = smov 0   ;;  %s833_s16 = smov 0   ;;  %s922_s0 = inlined_call_operand.vmem [shape: bf16[2,1,16,216], index: 0, kind: input, shape index: {}]   ;;  %s923_s1 = inlined_call_operand.vmem [shape: bf16[216,128], index: 1, kind: input, shape index: {}]   ;;  %s924_s2 = inlined_call_operand.vmem [shape: bf16[2,1,16,128], index: 2, kind: output, shape index: {0}]   ;;  %s925_s3 = inlined_call_operand.vmem [shape: f32[2,1,1,128], index: 3, kind: output, shape index: {1}]   ;;  %s926_s4 = inlined_call_operand.vmem [shape: f32[2,1,1,128], index: 4, kind: output, shape index: {2}]  }
   0x1   :  { %s835_s17 = smov 0  }
   0x2 LB: > { %s34_s18 = sadd.s32 1, %s799_s16  ;;  %p704_p0 = scmp.ge.s32.totalorder %s803_s17, 1  ;;  %s803_s17 = sphi %s835_s17, %s15_s17   ;;  %s799_s16 = sphi %s833_s16, %s928_s16   ;;  %s795_s15 = sphi %s831_s15, %s927_s15  }
   0x3   : > { %p36_p1 = scmp.ge.s32.totalorder %s34_s18, 2  ;;  %p208_p2 = scmp.lt.s32.totalorder %s803_s17, 3 }
   0x5   : > { %s930_s18 = smov (%p36_p1, %s34_s18), 0  ;;  %p209_p3 = pnand %p704_p0, %p208_p2 }
   0x6   : > { %p264_p4 = scmp.lt.s32.totalorder (!%p209_p3), %s795_s15, 1 }
   0x7   : > { %212 = sbr.rel (%p209_p3) target bundleno = 283 (0x11b), region = 28 }
   0xc   : > { %v764_v0 = vld [vmem:[%s923_s1 + $0x38] sm:$0xff]   ;;  %v805_v1 = vmov 0   ;;  %v765_v2 = vld [vmem:[%s923_s1 + $0x30] sm:$0xff]   ;;  %s932_s15 = smov (!%p264_p4, %s795_s15), 1  ;;  %v766_v3 = vld [vmem:[%s923_s1 + $0x28] sm:$0xff]   ;;  %vm424_vm0 = vcmask 719872  }
   0xd   : > { %432 = vmatprep.subr.bf16.mxu0 %v805_v1  ;;  %s730_s25 = sshll.u32 %s932_s15, 4  ;;  %v767_v4 = vld [vmem:[%s923_s1 + $0x20] sm:$0xff]   ;;  %v768_v5 = vld [vmem:[%s923_s1 + $0x18] sm:$0xff]   ;;  %v769_v7 = vld [vmem:[%s923_s1 + $0x10] sm:$0xff]   ;;  %vm428_vm1 = vcmask 1043456   ;;  %s731_s29 = sshll.u32 %s932_s15, 3 }
   0xe   : > { %433 = vmatpush1.bf16.msra.mxu0 %v764_v0  ;;  %s867_s30 = scalar_lea.vmem %s922_s0, %s730_s25  ;;  %v770_v8 = vld [vmem:[%s923_s1 + $0x8] sm:$0xff]   ;;  %v771_v9 = vld [vmem:[%s923_s1] sm:$0xff]   ;;  %v774_v13 = vld [vmem:[%s923_s1 + $0x58] sm:$0xff]   ;;  %s290_s7 = scalar_lea.vmem %s924_s2, %s731_s29 }
   0xf   : > { %434 = vmatprep.subr.bf16.mxu0 %v805_v1  ;;  %v780_v6 = vld [vmem:[%s867_s30 + $0x4] ss:$8 sps:$4 sm:$0xff]   ;;  %v772_v10 = vld [vmem:[%s923_s1 + $0x68] ss:$0 sps:$4 sm:$0xff]   ;;  %v775_v14 = vld [vmem:[%s923_s1 + $0x50] sm:$0xff]   ;;  %s297_s9 = scalar_lea.vmem %s925_s3, %s932_s15  ;;  %s303_s12 = scalar_lea.vmem %s926_s4, %s932_s15 }
  0x10   : > { %725 = vmatprep.mubr.msk.bf16.mxu0 %vm424_vm0, %v780_v6  ;;  %v430_v11 = vsel %vm428_vm1, %v772_v10, 0  ;;  %v773_v12 = vld [vmem:[%s923_s1 + $0x60] sm:$0xff]   ;;  %v776_v15 = vld [vmem:[%s923_s1 + $0x48] sm:$0xff]  }
  0x11   : > { %v777_v16 = vld [vmem:[%s923_s1 + $0x40] sm:$0xff]  }
  0x12   : > { %435 = vmatpush1.bf16.msra.mxu0 %v765_v2  ;;  %v778_v17 = vld [vmem:[%s867_s30] ss:$8 sps:$4 sm:$0xff]  }
  0x13   : > { %436 = vmatprep.subr.bf16.mxu0 %v805_v1 }
  0x16   : > { %437 = vmatpush1.bf16.msra.mxu0 %v766_v3 }
  0x17   : > { %438 = vmatprep.subr.bf16.mxu0 %v805_v1 }
  0x1a   : > { %439 = vmatpush1.bf16.msra.mxu0 %v767_v4 }
  0x1b   : > { %440 = vmatprep.subr.bf16.mxu0 %v805_v1 }
  0x1e   : > { %441 = vmatpush1.bf16.msra.mxu0 %v768_v5 }
  0x1f   : > { %442 = vmatprep.subr.bf16.mxu0 %v805_v1 }
  0x22   : > { %443 = vmatpush1.bf16.msra.mxu0 %v769_v7 }
  0x23   : > { %444 = vmatprep.subr.bf16.mxu0 %v805_v1 }
  0x26   : > { %445 = vmatpush1.bf16.msra.mxu0 %v770_v8 }
  0x27   : > { %446 = vmatprep.subr.bf16.mxu0 %v805_v1 }
  0x2a   : > { %447 = vmatpush1.bf16.msra.mxu0 %v771_v9 }
  0x2b   : > { %452 = vmatprep.subr.bf16.mxu0 %v805_v1 }
  0x2e   : > { %453 = vmatpush2.bf16.msra.mxu0 %v430_v11 }
  0x2f   : > { %454 = vmatprep.subr.bf16.mxu0 %v805_v1 }
  0x32   : > { %455 = vmatpush2.bf16.msra.mxu0 %v773_v12 }
  0x33   : > { %456 = vmatprep.subr.bf16.mxu0 %v805_v1 }
  0x36   : > { %457 = vmatpush2.bf16.msra.mxu0 %v774_v13 }
  0x37   : > { %458 = vmatprep.subr.bf16.mxu0 %v805_v1 }
  0x3a   : > { %459 = vmatpush2.bf16.msra.mxu0 %v775_v14 }
  0x3b   : > { %460 = vmatprep.subr.bf16.mxu0 %v805_v1 }
  0x3e   : > { %461 = vmatpush2.bf16.msra.mxu0 %v776_v15 }
  0x3f   : > { %462 = vmatprep.subr.bf16.mxu0 %v805_v1 }
  0x42   : > { %463 = vmatpush2.bf16.msra.mxu0 %v777_v16 }
  0x45   : > { %465 = vmatmul.mubr.bf16.vlgmr.msra.gmra.mxu0 %v778_v17 }
 0x105   : > { %v466_v18 = vpop.f32.mrf.mxu0 }
 0x106   : > { %v490_v21 = vmul.f32 %v466_v18, %v466_v18 }
 0x107   : > { %v468_v19 = vpop.f32.mrf.mxu0 }
 0x109   : > { %v469_v20 = vpop.f32.mrf.mxu0 }
 0x10a   : > { %v737_v22 = vpack.c.bf16 %v469_v20, %v466_v18  ;;  %v483_v23 = vadd.f32 %v469_v20, %v466_v18  ;;  %v491_v24 = vmul.f32 %v469_v20, %v469_v20 }
 0x10b   : > { %v471_v25 = vpop.f32.mrf.mxu0 }
 0x10c   : > { %738 = vst [vmem:[%s290_s7] sm:$0xff] %v737_v22   ;;  %v484_v26 = vrot.slane %v483_v23, 4  ;;  %v492_v27 = vadd.f32 %v491_v24, %v490_v21 }
 0x10e   : > { %v485_v28 = vadd.f32 %v484_v26, %v483_v23  ;;  %v493_v29 = vrot.slane %v492_v27, 4 }
 0x110   : > { %v486_v30 = vrot.slane %v485_v28, 2  ;;  %v494_v31 = vadd.f32 %v493_v29, %v492_v27 }
 0x112   : > { %v487_v32 = vadd.f32 %v486_v30, %v485_v28  ;;  %v495_v33 = vrot.slane %v494_v31, 2 }
 0x114   : > { %v488_v34 = vrot.slane %v487_v32, 1  ;;  %v496_v35 = vadd.f32 %v495_v33, %v494_v31 }
 0x116   : > { %v489_v36 = vadd.f32 %v488_v34, %v487_v32  ;;  %v497_v37 = vrot.slane %v496_v35, 1 }
 0x118   : > { %v498_v38 = vadd.f32 %v497_v37, %v496_v35  ;;  %503 = vst [vmem:[%s297_s9] sm:$0x1] %v489_v36 }
 0x11a   : > { %504 = vst [vmem:[%s303_s12] sm:$0x1] %v498_v38 }
 0x11b PF: > { %s15_s17 = sadd.s32 1, %s803_s17   ;;  %s927_s15 = smov %s799_s16 }
 0x11c   : > { %p12_p5 = scmp.ge.s32.totalorder %s15_s17, 4   ;;  %s928_s16 = smov %s930_s18 }
 0x11e   :  { %14 = sbr.rel (!%p12_p5) target bundleno = 2 (0x2), region = 90 }

</bundles_post_ra>
